<compile_context>
chip_gen: v7x
topology: tpu7x:2x2x1
jax: 0.10.0
libtpu: 0.0.40
codegen_flags: <defaults>
</compile_context>

<pallas_src>
import math

import jax
import jax.numpy as jnp
from jax.experimental import pallas as pl
from jax.experimental.pallas import tpu as pltpu

CLAMP_MIN = 1e-6
SQRT5 = math.sqrt(5.0)


def _round_up(x, m):
    return ((x + m - 1) // m) * m


# -------------------- deterministic tiny MLPs (glue, plain JAX) --------------------
def init_mlp_params(key, in_dim, hidden_dims, out_dim):
    dims = [in_dim] + list(hidden_dims) + [out_dim]
    params = []
    for d_in, d_out in zip(dims[:-1], dims[1:]):
        key, wk = jax.random.split(key)
        scale = 1.0 / math.sqrt(d_in)
        W = jax.random.uniform(wk, (d_in, d_out), jnp.float32, -scale, scale)
        b = jnp.zeros((d_out,), jnp.float32)
        params.append((W, b))
    return params


def mlp_forward(params, x):
    h = x
    for i, (W, b) in enumerate(params):
        h = h @ W + b
        if i < len(params) - 1:
            h = jax.nn.relu(h)
    return h


def softplus(x):
    return jnp.logaddexp(0.0, x)


# -------------------- Pallas kernel: fused (Matern-2.5 + SE) gram tile --------------------
def kernel_addition_gram_kernel(params_ref, x1_ref, x2t_ref, x1n_ref, x2n_ref, o_ref):
    # params_ref : SMEM (4,) = [a1, v1sq, a2, v2sq]  (derived scalars, scalar prefetch)
    #              a1 = 5/ls1^2, v1sq = var1^2, a2 = -0.5/ls2^2, v2sq = var2^2
    # x1_ref     : VMEM (TM, D)  tile of X1
    # x2t_ref    : VMEM (D, TN)  tile of X2^T (pre-transposed in wrapper)
    # x1n_ref    : VMEM (TM, 1)  precomputed row norms of X1
    # x2n_ref    : VMEM (1, TN)  precomputed row norms of X2
    # o_ref      : VMEM (TM, TN) lane-dense output tile
    a1 = params_ref[0]
    v1sq = params_ref[1]
    a2 = params_ref[2]
    v2sq = params_ref[3]

    x1 = x1_ref[...].astype(jnp.float32)
    x2t = x2t_ref[...].astype(jnp.float32)

    # Raw squared distances, computed once and shared by both child kernels.
    # HIGHEST precision: MXU is a rounding error at K=D=8; avoids bf16 cancellation.
    cross = jnp.dot(x1, x2t, preferred_element_type=jnp.float32,
                    precision=jax.lax.Precision.HIGHEST)                   # (TM, TN)
    raw = jnp.maximum(x1n_ref[...] + x2n_ref[...] - 2.0 * cross, 0.0)      # clamp once, reuse

    # ---- kernel1: Matern nu=2.5 ----  (u = 5*sq1 with sq1 clamped at 1e-6)
    u = jnp.maximum(raw * a1, 5.0 * CLAMP_MIN)
    t = jnp.sqrt(u)
    k1 = v1sq * (1.0 + t + u * (1.0 / 3.0)) * jnp.exp(-t)

    # ---- kernel2: SE / RBF ----
    k2 = v2sq * jnp.exp(raw * a2)

    o_ref[...] = (k1 + k2).astype(o_ref.dtype)


def kernel_addition_gram(x1, x2, ls1, var1, ls2, var2, *, tm=512, tn=1024):
    """Gram matrix of Matern25(ls1,var1) + SE(ls2,var2), tiled 2-D over (N1, N2)."""
    n1, d = x1.shape
    n2, d2 = x2.shape
    assert d == d2

    x1 = x1.astype(jnp.float32)
    x2 = x2.astype(jnp.float32)

    # Padding-aware tile selection: balanced tiles so n1p/n2p hug N1/N2.
    # Rows multiple of 8, cols multiple of 128 (lane-dense full-width stores).
    tm_eff = _round_up(pl.cdiv(n1, pl.cdiv(n1, tm)), 8)
    tn_eff = _round_up(pl.cdiv(n2, pl.cdiv(n2, tn)), 128)
    n1p = _round_up(n1, tm_eff)
    n2p = _round_up(n2, tn_eff)

    # Megacore-friendly (v7x has 2 TCs): if everything fits one tile, split N1.
    if (n1p // tm_eff == 1) and (n2p // tn_eff == 1) and tm_eff >= 16:
        tm_eff = _round_up(pl.cdiv(n1, 2), 8)
        n1p = _round_up(n1, tm_eff)

    # Wrapper-side preprocessing (done once, in XLA): pad, transpose X2, row norms,
    # and fold hyperparameters into the scalars actually consumed per element.
    x1_p = jnp.pad(x1, ((0, n1p - n1), (0, 0)))
    x2t_p = jnp.pad(x2.T, ((0, 0), (0, n2p - n2)))                         # (D, N2p)
    x1n_p = jnp.pad(jnp.sum(x1 * x1, axis=-1, keepdims=True), ((0, n1p - n1), (0, 0)))  # (N1p, 1)
    x2n_p = jnp.pad(jnp.sum(x2 * x2, axis=-1)[None, :], ((0, 0), (0, n2p - n2)))        # (1, N2p)

    a1 = 5.0 / (ls1 * ls1)
    v1sq = var1 * var1
    a2 = -0.5 / (ls2 * ls2)
    v2sq = var2 * var2
    params = jnp.stack([a1, v1sq, a2, v2sq]).astype(jnp.float32)           # (4,) SMEM prefetch

    grid = (n1p // tm_eff, n2p // tn_eff)

    grid_spec = pltpu.PrefetchScalarGridSpec(
        num_scalar_prefetch=1,
        grid=grid,
        in_specs=[
            pl.BlockSpec((tm_eff, d), lambda i, j, p: (i, 0)),        # X1 row tile
            pl.BlockSpec((d, tn_eff), lambda i, j, p: (0, j)),        # X2^T column tile
            pl.BlockSpec((tm_eff, 1), lambda i, j, p: (i, 0)),        # |x1|^2 tile
            pl.BlockSpec((1, tn_eff), lambda i, j, p: (0, j)),        # |x2|^2 tile
        ],
        out_specs=pl.BlockSpec((tm_eff, tn_eff), lambda i, j, p: (i, j)),
    )

    # VMEM budget: double-buffered inputs + output tile, plus headroom; 32 MiB v7x-safe cap.
    tile_bytes = 4 * (tm_eff * d + d * tn_eff + tm_eff + tn_eff + tm_eff * tn_eff)
    vmem_limit = min(max(4 * tile_bytes + (4 << 20), 8 << 20), 32 << 20)

    cost = pl.CostEstimate(
        flops=int(2 * n1 * n2 * d + 15 * n1 * n2),
        transcendentals=int(3 * n1 * n2),                                  # 2 exp + 1 sqrt / elem
        bytes_accessed=int(4 * (n1 * d + d * n2 + n1 + n2 + n1 * n2)),
    )

    out = pl.pallas_call(
        kernel_addition_gram_kernel,
        out_shape=jax.ShapeDtypeStruct((n1p, n2p), jnp.float32),
        grid_spec=grid_spec,
        compiler_params=pltpu.CompilerParams(
            dimension_semantics=("parallel", "parallel"),
            vmem_limit_bytes=int(vmem_limit),
        ),
        cost_estimate=cost,
    )(params, x1_p, x2t_p, x1n_p, x2n_p)

    return out[:n1, :n2]


# -------------------- KernelAddition forward (STANDARD eval mode) --------------------
def kernel_addition_forward(mlp1_params, mlp2_params, X1, X2, kernel_embedding):
    # child 1 (Matern-2.5): params = softplus(MLP1(emb)) -> (lengthscale, variance)
    p1 = softplus(mlp_forward(mlp1_params, kernel_embedding))
    # child 2 (SE):         params = softplus(MLP2(emb)) -> (lengthscale, variance)
    p2 = softplus(mlp_forward(mlp2_params, kernel_embedding))
    return kernel_addition_gram(X1, X2, p1[0], p1[1], p2[0], p2[1])


# -------------------- pure-JAX reference for verification --------------------
def reference_forward(mlp1_params, mlp2_params, X1, X2, kernel_embedding):
    p1 = softplus(mlp_forward(mlp1_params, kernel_embedding))
    p2 = softplus(mlp_forward(mlp2_params, kernel_embedding))
    ls1, v1 = p1[0], p1[1]
    ls2, v2 = p2[0], p2[1]

    x1n = jnp.sum(X1 * X1, axis=-1)[:, None]
    x2n = jnp.sum(X2 * X2, axis=-1)[None, :]
    cross = jnp.dot(X1, X2.T, precision=jax.lax.Precision.HIGHEST)
    raw = x1n + x2n - 2.0 * cross

    sq1 = jnp.maximum(raw / (ls1 * ls1), CLAMP_MIN)
    d1 = jnp.sqrt(sq1)
    k_mat = (v1 * v1) * (1.0 + SQRT5 * d1 + (5.0 / 3.0) * sq1) * jnp.exp(-SQRT5 * d1)

    sq2 = jnp.maximum(raw / (ls2 * ls2), 0.0)
    k_se = (v2 * v2) * jnp.exp(-0.5 * sq2)

    return k_mat + k_se


if __name__ == "__main__":
    key = jax.random.PRNGKey(0)
    k_emb, k_x1, k_x2, k_mlp1, k_mlp2 = jax.random.split(key, 5)

    kernel_embedding_dim = 32
    dim_hidden_layer_list = [32]
    N1, N2, D = 16, 16, 8

    mlp1_params = init_mlp_params(k_mlp1, kernel_embedding_dim, dim_hidden_layer_list, 2)
    mlp2_params = init_mlp_params(k_mlp2, kernel_embedding_dim, dim_hidden_layer_list, 2)
    kernel_embedding = jax.random.normal(k_emb, (kernel_embedding_dim,), jnp.float32)
    X1 = jax.random.normal(k_x1, (N1, D), jnp.float32)
    X2 = jax.random.normal(k_x2, (N2, D), jnp.float32)

    K = kernel_addition_forward(mlp1_params, mlp2_params, X1, X2, kernel_embedding)
    K = jax.block_until_ready(K)

    K_ref = reference_forward(mlp1_params, mlp2_params, X1, X2, kernel_embedding)
    assert K.shape == (N1, N2)
    assert jnp.allclose(K, K_ref, atol=1e-4, rtol=1e-4), "Pallas result mismatch vs reference"

    # TODO(synk): get_log_prior_prob / get_untransformed_parameters / WARM_START & DEBUG eval
    # modes are host-side scalar glue with no Pallas hot path; only forward() is implemented.
    print("KERNEL_OK")
</pallas_src>

<mosaic_0001>
module attributes {stable_mosaic.version = 11 : i64} {
  func.func @kernel_addition_gram_kernel(%arg0: i32, %arg1: i32, %arg2: memref<4xf32, #tpu.memory_space<smem>>, %arg3: memref<8x8xf32, #tpu.memory_space<vmem>>, %arg4: memref<8x128xf32, #tpu.memory_space<vmem>>, %arg5: memref<8x1xf32, #tpu.memory_space<vmem>>, %arg6: memref<1x128xf32, #tpu.memory_space<vmem>>, %arg7: memref<8x128xf32, #tpu.memory_space<vmem>>) attributes {dimension_semantics = [#tpu.dimension_semantics<parallel>, #tpu.dimension_semantics<parallel>], iteration_bounds = array<i64: 2, 1>, scalar_prefetch = 1 : i64, scratch_operands = 0 : i64, tpu.core_type = #tpu.core_type<tc>, window_params = [{transform_indices = @transform_0, window_bounds = array<i64: 8, 8>}, {transform_indices = @transform_1, window_bounds = array<i64: 8, 128>}, {transform_indices = @transform_2, window_bounds = array<i64: 8, 1>}, {transform_indices = @transform_3, window_bounds = array<i64: 1, 128>}, {transform_indices = @transform_4, window_bounds = array<i64: 8, 128>}]} {
    %c0 = arith.constant 0 : index
    %0 = memref.load %arg2[%c0] : memref<4xf32, #tpu.memory_space<smem>>
    %c1 = arith.constant 1 : index
    %1 = memref.load %arg2[%c1] : memref<4xf32, #tpu.memory_space<smem>>
    %c2 = arith.constant 2 : index
    %2 = memref.load %arg2[%c2] : memref<4xf32, #tpu.memory_space<smem>>
    %c3 = arith.constant 3 : index
    %3 = memref.load %arg2[%c3] : memref<4xf32, #tpu.memory_space<smem>>
    %c0_0 = arith.constant 0 : index
    %c0_1 = arith.constant 0 : index
    %4 = vector.load %arg3[%c0_0, %c0_1] : memref<8x8xf32, #tpu.memory_space<vmem>>, vector<8x8xf32>
    %c0_2 = arith.constant 0 : index
    %c0_3 = arith.constant 0 : index
    %5 = vector.load %arg4[%c0_2, %c0_3] : memref<8x128xf32, #tpu.memory_space<vmem>>, vector<8x128xf32>
    %cst = arith.constant dense<0.000000e+00> : vector<8x128xf32>
    %6 = tpu.matmul %4, %5, %cst {dimension_numbers = #tpu.dot_dimension_numbers<[1], [0], [0], [1], [0, 0, 1, 1], [], []>, precision = #tpu.contract_precision<fp32>} : vector<8x8xf32>, vector<8x128xf32>, vector<8x128xf32> -> vector<8x128xf32>
    %c0_4 = arith.constant 0 : index
    %c0_5 = arith.constant 0 : index
    %7 = vector.load %arg5[%c0_4, %c0_5] : memref<8x1xf32, #tpu.memory_space<vmem>>, vector<8x1xf32>
    %c0_6 = arith.constant 0 : index
    %c0_7 = arith.constant 0 : index
    %8 = vector.load %arg6[%c0_6, %c0_7] : memref<1x128xf32, #tpu.memory_space<vmem>>, vector<1x128xf32>
    %9 = vector.broadcast %7 : vector<8x1xf32> to vector<8x128xf32>
    %10 = vector.broadcast %8 : vector<1x128xf32> to vector<8x128xf32>
    %11 = arith.addf %9, %10 : vector<8x128xf32>
    %cst_8 = arith.constant 2.000000e+00 : f32
    %12 = vector.broadcast %cst_8 : f32 to vector<8x128xf32>
    %13 = arith.mulf %12, %6 : vector<8x128xf32>
    %14 = arith.subf %11, %13 : vector<8x128xf32>
    %cst_9 = arith.constant 0.000000e+00 : f32
    %15 = vector.broadcast %cst_9 : f32 to vector<8x128xf32>
    %16 = arith.maximumf %14, %15 : vector<8x128xf32>
    %17 = vector.broadcast %0 : f32 to vector<8x128xf32>
    %18 = arith.mulf %16, %17 : vector<8x128xf32>
    %cst_10 = arith.constant 5.000000e-06 : f32
    %19 = vector.broadcast %cst_10 : f32 to vector<8x128xf32>
    %20 = arith.maximumf %18, %19 : vector<8x128xf32>
    %21 = math.sqrt %20 : vector<8x128xf32>
    %cst_11 = arith.constant 1.000000e+00 : f32
    %22 = vector.broadcast %cst_11 : f32 to vector<8x128xf32>
    %23 = arith.addf %22, %21 : vector<8x128xf32>
    %cst_12 = arith.constant 0.333333343 : f32
    %24 = vector.broadcast %cst_12 : f32 to vector<8x128xf32>
    %25 = arith.mulf %20, %24 : vector<8x128xf32>
    %26 = arith.addf %23, %25 : vector<8x128xf32>
    %27 = vector.broadcast %1 : f32 to vector<8x128xf32>
    %28 = arith.mulf %27, %26 : vector<8x128xf32>
    %cst_13 = arith.constant 0.000000e+00 : f32
    %29 = vector.broadcast %cst_13 : f32 to vector<8x128xf32>
    %30 = arith.subf %29, %21 : vector<8x128xf32>
    %31 = math.exp %30 : vector<8x128xf32>
    %32 = arith.mulf %28, %31 : vector<8x128xf32>
    %33 = vector.broadcast %2 : f32 to vector<8x128xf32>
    %34 = arith.mulf %16, %33 : vector<8x128xf32>
    %35 = math.exp %34 : vector<8x128xf32>
    %36 = vector.broadcast %3 : f32 to vector<8x128xf32>
    %37 = arith.mulf %36, %35 : vector<8x128xf32>
    %38 = arith.addf %32, %37 : vector<8x128xf32>
    %c0_14 = arith.constant 0 : index
    %c0_15 = arith.constant 0 : index
    %39 = vector.load %arg7[%c0_14, %c0_15] : memref<8x128xf32, #tpu.memory_space<vmem>>, vector<8x128xf32>
    tpu.vector_store %arg7[%c0_14, %c0_15], %38 {strides = array<i32>} : memref<8x128xf32, #tpu.memory_space<vmem>>, vector<8x128xf32>,
    return
  }
  func.func @transform_0(%arg0: i32, %arg1: i32, %arg2: memref<4xf32, #tpu.memory_space<smem>>) -> (i32, i32) {
    %c0_i32 = arith.constant 0 : i32
    %c0_i32_0 = arith.constant 0 : i32
    return %arg0, %c0_i32 : i32, i32
  }
  func.func @transform_1(%arg0: i32, %arg1: i32, %arg2: memref<4xf32, #tpu.memory_space<smem>>) -> (i32, i32) {
    %c0_i32 = arith.constant 0 : i32
    %c0_i32_0 = arith.constant 0 : i32
    return %c0_i32, %arg1 : i32, i32
  }
  func.func @transform_2(%arg0: i32, %arg1: i32, %arg2: memref<4xf32, #tpu.memory_space<smem>>) -> (i32, i32) {
    %c0_i32 = arith.constant 0 : i32
    %c0_i32_0 = arith.constant 0 : i32
    return %arg0, %c0_i32 : i32, i32
  }
  func.func @transform_3(%arg0: i32, %arg1: i32, %arg2: memref<4xf32, #tpu.memory_space<smem>>) -> (i32, i32) {
    %c0_i32 = arith.constant 0 : i32
    %c0_i32_0 = arith.constant 0 : i32
    return %c0_i32, %arg1 : i32, i32
  }
  func.func @transform_4(%arg0: i32, %arg1: i32, %arg2: memref<4xf32, #tpu.memory_space<smem>>) -> (i32, i32) {
    %c0_i32 = arith.constant 0 : i32
    return %arg0, %arg1 : i32, i32
  }
}

</mosaic_0001>

<bundles_post_ra>
// kernel: tpu_custom_call.1
= control target key start
LH: loop header
LB: loop body
LE: loop exit
PB: predicated region body
PF: predicated region fallthrough
CT: control target
= control target key end

     0   :  { %s1278_s0 = inlined_call_operand.vmem [shape: f32[4], index: 0, kind: input, shape index: {}]   ;;  %s1279_s1 = inlined_call_operand.vmem [shape: f32[16,8], index: 1, kind: input, shape index: {}]   ;;  %s1280_s2 = inlined_call_operand.vmem [shape: f32[8,128], index: 2, kind: input, shape index: {}]   ;;  %s1281_s3 = inlined_call_operand.vmem [shape: f32[16,1], index: 3, kind: input, shape index: {}]   ;;  %s1282_s4 = inlined_call_operand.vmem [shape: f32[1,128], index: 4, kind: input, shape index: {}]   ;;  %s1283_s5 = inlined_call_operand.hbm [shape: f32[16,128], index: 5, kind: output, shape index: {}]  }
   0x1   :  { %s10_s20 = sshll.u32 %s1278_s0, 4  ;;  %s11_s20 = int_to_ptr.vmem [resolvable:$true] %s10_s20 }
   0x2   :  { %s1019_s21 = scalar_lea.vmem %s11_s20, 16  ;;  %p1024_p1 = scmp.lt.s32.totalorder %s11_s20, %s11_s20 }
   0x3   :  { %p1020_p0 = scmp.ne.s32.totalorder %s11_s20, %s1019_s21  ;;  %p1025_p2 = scmp.lt.s32.totalorder %s1019_s21, %s1019_s21 }
   0x5   :  { %p1026_p3 = por %p1025_p2, %p1024_p1 }
   0x7   :  { %p1027_p4 = pnand %p1026_p3, %p1020_p0 }
   0x9   :  { %1030 = shalt.err (!%p1027_p4)  }
   0xa   :  { %s1113_s22 = smov [#allocation3]  }
   0xb   :  { %13 = dma.vmem_to_smem %s11_s20, 16, %s1113_s22, [#allocation2] }
   0xc   :  { %1083 = dma.done.wait [#allocation2], 16 }
   0xd   :  { %1084 = vsyncadd [#allocation2], 4294967280 }
   0xe   :  { %15 = sfence }
   0xf   :  { %16 = vsyncpa [#allocation5], 0 }
  0x10   :  { %18 = vsyncpa [#allocation5 + $0x1], 0  ;;  %s1151_s23 = smov 0   ;;  %s1153_s24 = smov 0  }
  0x11   :  { %s1155_s0 = smov 0   ;;  %s1157_s25 = smov 0  }
  0x12   :  { %s1159_s26 = smov 0   ;;  %s1161_s27 = smov 0  }
  0x13 LB: > { %s884_s28 = sadd.s32 4294967295, %s1111_s27   ;;  %s885_s29 = sadd.s32 4294967294, %s1111_s27   ;;  %s1111_s27 = sphi %s1161_s27, %s24_s27   ;;  %s1107_s26 = sphi %s1159_s26, %s1290_s26   ;;  %s1103_s25 = sphi %s1157_s25, %s1289_s25   ;;  %s1099_s0 = sphi %s1155_s0, %s1288_s0   ;;  %s1095_s24 = sphi %s1153_s24, %s1287_s24   ;;  %s1091_s23 = sphi %s1151_s23, %s1286_s23  }
  0x14   : > { %s36_s30 = sadd.s32 1, %s1107_s26  ;;  %s149_s6 = sadd.s32 1, %s1099_s0 }
  0x15   : > { %p38_p5 = scmp.ge.s32.totalorder %s36_s30, 2  ;;  %p159_p6 = scmp.ne.s32.totalorder %s1099_s0, %s1095_s24 }
  0x16   : > { %p160_p7 = scmp.eq.s32.totalorder %s884_s28, 1  ;;  %p165_p8 = scmp.ne.s32.totalorder %s1095_s24, %s1091_s23 }
  0x17   : > { %s1292_s30 = smov (%p38_p5, %s36_s30), 0  ;;  %p166_p10 = scmp.eq.s32.totalorder %s885_s29, 1 }
  0x18   : > { %p1191_p9 = por %p160_p7, %p159_p6  ;;  %s144_s8 = ssub.s32 %s1107_s26, %s1292_s30 }
  0x19   : > { %p890_p11 = scmp.ge.s32.totalorder %s1111_s27, 1  ;;  %p147_p12 = scmp.eq.s32.totalorder %s144_s8, 0 }
  0x1a   : > { %p1198_p13 = por %p166_p10, %p165_p8  ;;  %p211_p0 = scmp.lt.s32.totalorder %s1111_s27, 3 }
  0x1b   : > { %s1204_s10 = scalar_select %p147_p12, %s1099_s0, %s149_s6  }
  0x1c   : > { %p212_p1 = pnand %p890_p11, %p211_p0 }
  0x1d   : > { %v267_v0 = vld [vmem:[%s1280_s2] sm:$0xff] (!%p212_p1)  ;;  %p247_p2 = scmp.lt.s32.totalorder (!%p212_p1), %s1103_s25, 1  ;;  %v1114_v1 = vmov (!%p212_p1), 0.0   ;;  %vm1115_vm0 = vmmov (!%p212_p1), 0   ;;  %vm268_vm1 = vcmask (!%p212_p1), 64512   ;;  %v1116_v4 = vmov (!%p212_p1), 0  }
  0x1e   : > { %215 = sbr.rel (%p212_p1) target bundleno = 341 (0x155), region = 36  ;;  %929 = vmatprep.subr.mxu0 (!%p212_p1), %v1114_v1  ;;  %v273_v2 = vand.u32 (!%p212_p1), 4294901760, %v267_v0  ;;  %931 = vmatprep.mubr.msk.f32.mxu0 (!%p212_p1), %vm1115_vm0, %v1114_v1  ;;  %s262_s21 = sld [smem:[#allocation3]] (!%p212_p1)  ;;  %v897_v18 = vld [vmem:[%s1282_s4] ss:$0 sm:$0xff] (!%p212_p1) }
  0x1f   : > { %914 = vmatprep.subr.mxu1 (!%p212_p1), %v1114_v1  ;;  %916 = vmatprep.mubr.msk.f32.mxu1 (!%p212_p1), %vm1115_vm0, %v1114_v1  ;;  %s895_s29 = sld [smem:[#allocation3 + $0x2]] (!%p212_p1)  ;;  %s894_s6 = sld [smem:[#allocation3 + $0x1]] (!%p212_p1) }
  0x20   : > { %v350_v3 = vsub.f32 (!%p212_p1), %v267_v0, %v273_v2  ;;  %930 = vmatpush3.msra.mxu0 (!%p212_p1), %v273_v2  ;;  %915 = vmatpush3.msra.mxu1 (!%p212_p1), %v273_v2  ;;  %s896_s8 = sld [smem:[#allocation3 + $0x3]] (!%p212_p1)  ;;  %s244_s11 = sand.u32 (!%p212_p1), 1, %s1095_s24  }
  0x21   : > { %919 = vmatprep.subr.mxu1 (!%p212_p1), %v1114_v1  ;;  %934 = vmatprep.subr.mxu0 (!%p212_p1), %v1114_v1  ;;  %s891_s12 = sshll.u32 (!%p212_p1), %s244_s11, 3  ;;  %s763_s19 = scalar_lea.sflag (!%p212_p1), [#allocation5], %s244_s11 }
  0x22   : > { %1012 = vset.pattern.permute.xlu0 (!%p212_p1), %v1116_v4  ;;  %v351_v8 = vand.u32 (!%p212_p1), 4294901760, %v350_v3 }
  0x24   : > { %v352_v11 = vsub.f32 (!%p212_p1), %v350_v3, %v351_v8  ;;  %v735_v26 = vstv (!%p212_p1), %s262_s21 }
  0x25   : > { %s248_s13 = scalar_select %p247_p2, %s1103_s25, 1  ;;  %v754_v30 = vstv %s895_s29  ;;  %v748_v43 = vstv %s894_s6 }
  0x26   : > { %v353_v14 = vand.u32 4294901760, %v352_v11  ;;  %v758_v45 = vstv %s896_s8 }
  0x27   : > { %s892_s14 = sshll.u32 %s248_s13, 3  ;;  %s899_s13 = sshll.u32 %s1103_s25, 7 }
  0x28   : > { %s250_s17 = scalar_lea.vmem %s1279_s1, %s892_s14  ;;  %s258_s20 = scalar_lea.vmem %s1281_s3, %s892_s14 }
  0x29   : > { %v266_v5 = vld [vmem:[%s250_s17] sm:$0xff]  ;;  %s246_s14 = scalar_lea.vmem [#allocation4], %s891_s12  ;;  %s1231_s18 = scalar_lea.hbm %s1283_s5, %s899_s13 }
  0x2a   : > { %v718_v6 = vld [vmem:[%s258_s20] sm:$0xff]  ;;  %v270_v7 = vsel %vm268_vm1, %v266_v5, 0  ;;  %s777_s15 = sshll.u32 %s246_s14, 4  ;;  %s1117_s25 = smov [#allocation4]   ;;  %s1233_s15 = int_to_ptr.vmem [resolvable:$true] %s777_s15 }
  0x2b   : > { %722 = vperm.xlu0 %1012, %v718_v6   ;;  %v338_v9 = vand.u32 4294901760, %v270_v7  ;;  %s1031_s20 = scalar_lea.vmem %s1233_s15, 128  ;;  %s1035_s21 = sshll.u32 %s1117_s25, 4  ;;  %s1036_s21 = int_to_ptr.vmem [resolvable:$false] %s1035_s21 }
  0x2c   : > { %p1032_p3 = scmp.ne.s32.totalorder %s1233_s15, %s1031_s20  ;;  %s1037_s22 = scalar_lea.vmem %s1036_s21, 256 }
  0x2d   : > { %v339_v10 = vsub.f32 %v270_v7, %v338_v9  ;;  %p1038_p6 = scmp.lt.s32.totalorder %s1233_s15, %s1036_s21  ;;  %p1039_p7 = scmp.lt.s32.totalorder %s1037_s22, %s1031_s20 }
  0x2e   : > { %p1033_p4 = pnand %p1032_p3, %p1191_p9 }
  0x2f   : > { %v340_v12 = vand.u32 4294901760, %v339_v10  ;;  %p1040_p8 = por %p1039_p7, %p1038_p6 }
  0x30   : > { %p1034_p5 = pneg %p1033_p4 }
  0x31   : > { %932 = vmatmul.mubr.f32.vlgmr.msra.gmra.mrb[0].mxu0 %v340_v12  ;;  %v341_v13 = vsub.f32 %v339_v10, %v340_v12 }
  0x32   : > { %935 = vmatpush3.msra.mxu0 %v351_v8  ;;  %936 = vmatprep.mubr.msk.f32.mxu0 %vm1115_vm0, %v1114_v1  ;;  %p1041_p10 = pnand %p1040_p8, %p1034_p5 }
  0x33   : > { %v342_v15 = vand.u32 4294901760, %v341_v13  ;;  %939 = vmatprep.subr.mxu0 %v1114_v1 }
  0x35   : > { %917 = vmatmul.mubr.f32.vlgmr.msra.gmra.mrb[0].mxu1 %v342_v15 }
  0x36   : > { %920 = vmatpush3.msra.mxu1 %v353_v14  ;;  %921 = vmatprep.mubr.msk.f32.mxu1 %vm1115_vm0, %v1114_v1 }
  0x37   : > { %924 = vmatprep.subr.mxu1 %v1114_v1 }
  0x39   : > { %937 = vmatmul.mubr.f32.vlgmr.msra.gmra.mrb[0].mxu0 %v338_v9 }
  0x3a   : > { %940 = vmatpush3.msra.mxu0 %v273_v2  ;;  %941 = vmatprep.mubr.msk.f32.mxu0 %vm1115_vm0, %v1114_v1 }
  0x3d   : > { %922 = vmatmul.mubr.f32.vlgmr.msra.gmra.mrb[0].mxu1 %v338_v9 }
  0x3e   : > { %925 = vmatpush3.msra.mxu1 %v350_v3  ;;  %926 = vmatprep.mubr.msk.f32.mxu1 %vm1115_vm0, %v1114_v1 }
  0x41   : > { %942 = vmatmul.mubr.f32.vlgmr.msra.gmra.mrb[0].mxu0 %v338_v9 }
  0x45   : > { %927 = vmatmul.mubr.f32.vlgmr.msra.gmra.mrb[0].mxu1 %v339_v10 }
  0xaa   : > { %v723_v19 = vpop.permute.xlu0 %722 }
  0xab   : > { %v731_v23 = vadd.f32 %v897_v18, %v723_v19 }
 0x114   : > { %v714_v16 = vpop.f32.mrb[0].mxu0 }
 0x115   : > { %v943_v17 = vpop.f32.mrb[1].mxu0 }
 0x118   : > { %v494_v20 = vpop.f32.mrb[0].mxu1 }
 0x119   : > { %v944_v21 = vadd.f32 %v714_v16, %v494_v20  ;;  %v928_v22 = vpop.f32.mrb[1].mxu1 }
 0x11b   : > { %v732_v24 = vmul.f32 2.0, %v944_v21 }
 0x11d   : > { %v733_v25 = vsub.f32 %v731_v23, %v732_v24 }
 0x11f   : > { %v734_v27 = vmax.f32 %v733_v25, 0.0 }
 0x121   : > { %v736_v28 = vmul.f32 %v735_v26, %v734_v27  ;;  %v755_v31 = vmul.f32 %v754_v30, %v734_v27 }
 0x123   : > { %v737_v29 = vmax.f32 %v736_v28, 5e-06  ;;  %v756_v35 = vmul.f32 1.442695, %v755_v31 }
 0x125   : > { %1013 = vrsqrt.f32 %v737_v29  ;;  %vm740_vm2 = vcmp.eq.f32.partialorder %v737_v29, inf  ;;  %v743_v34 = vand.u32 2147483648, %v737_v29  ;;  %vm742_vm3 = vcmp.eq.f32.partialorder %v737_v29, 0.0 }
 0x126   : > { %1015 = vpow2.f32 %v756_v35  ;;  %v746_v41 = vmul.f32 0.33333334, %v737_v29 }
 0x12f   : > { %v1014_v32 = vpop.eup %1013 }
 0x130   : > { %v739_v33 = vmul.f32 %v1014_v32, %v737_v29  ;;  %v1016_v44 = vpop.eup %1015 }
 0x131   : > { %v759_v49 = vmul.f32 %v1016_v44, %v758_v45 }
 0x132   : > { %v741_v36 = vsel %vm740_vm2, %v737_v29, %v739_v33 }
 0x133   : > { %v744_v37 = vsel %vm742_vm3, %v743_v34, %v741_v36 }
 0x134   : > { %v750_v38 = vsub.f32 0.0, %v744_v37  ;;  %v745_v40 = vadd.f32 1.0, %v744_v37 }
 0x136   : > { %v751_v39 = vmul.f32 1.442695, %v750_v38  ;;  %v747_v42 = vadd.f32 %v746_v41, %v745_v40 }
 0x138   : > { %1017 = vpow2.f32 %v751_v39  ;;  %v749_v46 = vmul.f32 %v748_v43, %v747_v42 }
 0x142   : > { %v1018_v47 = vpop.eup %1017 }
 0x143   : > { %v753_v48 = vmul.f32 %v1018_v47, %v749_v46 }
 0x145   : > { %v760_v50 = vadd.f32 %v759_v49, %v753_v48 }
 0x147   : > { %761 = vst [vmem:[%s246_s14] sm:$0xff] %v760_v50 }
 0x148   : > { %1044 = shalt.err (!%p1041_p10)
}
 0x149   : > { %s1045_s28 = scalar_lea.hbm %s1231_s18, 128  ;;  %s1049_s8 = scalar_lea.hbm %s1283_s5, 256 }
 0x14a   : > { %p1046_p11 = scmp.ne.s32.totalorder %s1231_s18, %s1045_s28  ;;  %p1050_p1 = scmp.lt.u32.totalorder %s1231_s18, %s1283_s5 }
 0x14b   : > { %p1051_p2 = scmp.lt.u32.totalorder %s1049_s8, %s1045_s28  ;;  %p1053_p4 = scmp.lt.u32.totalorder %s1045_s28, %s1231_s18 }
 0x14c   : > { %p1047_p12 = pnand %p1046_p11, %p1191_p9 }
 0x14d   : > { %p1052_p3 = por %p1051_p2, %p1050_p1 }
 0x14e   : > { %p1048_p0 = pneg %p1047_p12 }
 0x14f   : > { %p1054_p5 = por %p1053_p4, %p1052_p3 }
 0x151   : > { %p1055_p6 = pnand %p1054_p5, %p1048_p0 }
 0x153   : > { %1058 = shalt.err (!%p1055_p6)
}
 0x154   : > { %953 = dma.vmem_to_hbm [thread:$0]  (%p1191_p9), %s1233_s15, 128, %s1231_s18, %s763_s19  }
 0x155 PF: > { %p959_p7 = scmp.ge.s32.totalorder %s1111_s27, 2  ;;  %s789_s13 = sand.u32 1, %s1091_s23  }
 0x156   : > { %s790_s14 = scalar_lea.sflag [#allocation5], %s789_s13 }
 0x157   : > { %p956_p8 = pnand %p959_p7, %p1198_p13 }
 0x159   : > { %1086 = dma.done.wait (!%p956_p8), %s790_s14, 128  }
 0x15a   : > { %1088 = vsyncadd (!%p956_p8), %s790_s14, 4294967168  ;;  %s24_s27 = sadd.s32 1, %s1111_s27   ;;  %s1286_s23 = smov %s1095_s24 }
 0x15b   : > { %p21_p10 = scmp.ge.s32.totalorder %s24_s27, 4   ;;  %s1287_s24 = smov %s1099_s0 }
 0x15c   : > { %s1288_s0 = smov %s1204_s10  ;;  %s1289_s25 = smov %s1107_s26 }
 0x15d   : > { %s1290_s26 = smov %s1292_s30  ;;  %23 = sbr.rel (!%p21_p10) target bundleno = 19 (0x13), region = 80 }
 0x164   :  { %795 = vsyncpa [#allocation5], 1 }
 0x165   :  { %797 = vsyncpa [#allocation5 + $0x1], 1 }

</bundles_post_ra>
